<compile_context>
chip_gen: v5e
topology: v5e:2x2
jax: 0.10.0
libtpu: 0.0.40
codegen_flags: <defaults>
</compile_context>

<pallas_src>
import functools

import jax
import jax.numpy as jnp
from jax.experimental import pallas as pl
from jax.experimental.pallas import tpu as pltpu


def _round_up(x, m):
    return (x + m - 1) // m * m


def _tile_nll_sum(logits, labels, cols, row_valid):
    """sum_b -log_softmax(logits)[b, labels_b] over one batch tile.

    logits: [TB, C] float, labels: [TB, 1] int32, cols: [TB, C] int32 iota,
    row_valid: [TB, 1] bool. Invalid (out-of-bounds) rows contribute 0; the
    mask is a select so garbage / NaN in the OOB tail cannot propagate.
    """
    x = logits.astype(jnp.float32)
    m = jnp.max(x, axis=-1, keepdims=True)                           # [TB, 1]
    xs = x - m                                                       # shifted once, reused
    lse = jnp.log(jnp.sum(jnp.exp(xs), axis=-1, keepdims=True))      # [TB, 1]
    picked = jnp.sum(jnp.where(cols == labels, xs, 0.0),
                     axis=-1, keepdims=True)                         # x[b,l] - m
    per_row = lse - picked                                           # -log_softmax[b, l]
    per_row = jnp.where(row_valid, per_row, 0.0)
    return jnp.sum(per_row)


def _nq_loss_kernel(s_ref, e_ref, a_ref, lbl_ref, out_ref, *, batch):
    tb, s_len = s_ref.shape
    a_len = a_ref.shape[1]

    # Row-validity mask for the (possibly partial) last tile.
    rows = pl.program_id(0) * tb + jax.lax.broadcasted_iota(jnp.int32, (tb, 1), 0)
    valid = rows < batch

    lbl = lbl_ref[...]                                               # [TB, 3] int32

    # Column-id iotas hoisted; the S-wide one is shared by start & end heads
    # (JAX does not CSE broadcast/iota).
    cols_pos = jax.lax.broadcasted_iota(jnp.int32, (tb, s_len), 1)
    cols_ans = jax.lax.broadcasted_iota(jnp.int32, (tb, a_len), 1)

    partial = (_tile_nll_sum(s_ref[...], lbl[:, 0:1], cols_pos, valid)
               + _tile_nll_sum(e_ref[...], lbl[:, 1:2], cols_pos, valid)
               + _tile_nll_sum(a_ref[...], lbl[:, 2:3], cols_ans, valid))

    # Lane-dense (1, 8, 128) output block filled with the tile's partial sum;
    # the wrapper reads element [tile, 0, 0] and reduces over tiles.
    out_ref[...] = jnp.full(out_ref.shape, partial, dtype=jnp.float32)


def _choose_tile_b(B, S, A, itemsize):
    """Pick the batch tile.

    (a) keeps the double-buffered, lane-padded VMEM working set under ~10 MiB
        (fits v5e's 16 MiB scoped default; far under v6e/v7x limits),
    (b) is a multiple of the sublane packing for the logits dtype
        (8 for f32, 16 for bf16),
    (c) leaves >= 2 grid steps when the batch allows, so the "parallel" grid
        axis can shard across v7x's two TensorCores.
    """
    sublane = max(8, 32 // itemsize)
    lane = 128
    # VMEM bytes per tile row: two S-wide heads + answer head (lane padded)
    # + packed int32 labels (lane padded).
    row_bytes = (2 * _round_up(S, lane) + _round_up(A, lane)) * itemsize + lane * 4
    vmem_budget = 10 << 20
    tile = vmem_budget // (2 * row_bytes)            # /2: double buffering
    tile = max(sublane, (tile // sublane) * sublane)

    padded_b = _round_up(B, sublane)
    tile = min(tile, padded_b)
    if padded_b >= 2 * sublane:                      # prefer >= 2 tiles (v7x megacore)
        tile = min(tile, _round_up(padded_b // 2, sublane))
    if tile >= B:                                    # single full-array block is always legal
        tile = B
    return tile


def nq_loss(predict_start_logits, predict_end_logits, predict_answerType,
            start_position, end_position, answerType, *, tile_b=None):
    B, S = predict_start_logits.shape
    A = predict_answerType.shape[1]

    itemsize = jnp.dtype(predict_start_logits.dtype).itemsize
    if tile_b is None:
        tile_b = _choose_tile_b(B, S, A, itemsize)
    tile_b = min(tile_b, B)
    num_tiles = pl.cdiv(B, tile_b)

    # Pack the three tiny label vectors into one (B, 3) int32 array: one DMA
    # and one VMEM block per tile instead of three.  The big logits are NOT
    # padded; partial last tiles are masked inside the kernel.
    labels = jnp.stack(
        [start_position.astype(jnp.int32),
         end_position.astype(jnp.int32),
         answerType.astype(jnp.int32)], axis=-1)

    kernel = functools.partial(_nq_loss_kernel, batch=B)

    partials = pl.pallas_call(
        kernel,
        out_shape=jax.ShapeDtypeStruct((num_tiles, 8, 128), jnp.float32),
        grid=(num_tiles,),
        in_specs=[
            pl.BlockSpec((tile_b, S), lambda i: (i, 0)),   # start logits
            pl.BlockSpec((tile_b, S), lambda i: (i, 0)),   # end logits
            pl.BlockSpec((tile_b, A), lambda i: (i, 0)),   # answer-type logits
            pl.BlockSpec((tile_b, 3), lambda i: (i, 0)),   # packed labels
        ],
        out_specs=pl.BlockSpec((1, 8, 128), lambda i: (i, 0, 0)),
        compiler_params=pltpu.CompilerParams(
            dimension_semantics=("parallel",)),
    )(predict_start_logits, predict_end_logits, predict_answerType, labels)

    # Tiny cross-tile reduction in the wrapper keeps the grid axis "parallel".
    return jnp.sum(partials[:, 0, 0]) / 3.0


def _reference(s_logits, e_logits, a_logits, s_pos, e_pos, a_typ):
    def loss(logits, labels):
        lp = jax.nn.log_softmax(logits.astype(jnp.float32), axis=-1)
        picked = jnp.take_along_axis(lp, labels.astype(jnp.int32)[:, None], axis=-1)
        return -jnp.sum(picked)
    return (loss(s_logits, s_pos) + loss(e_logits, e_pos) + loss(a_logits, a_typ)) / 3.0


def _run_case(key, B, S, A, dtype=jnp.float32, tile_b=None):
    k1, k2, k3, k4, k5, k6 = jax.random.split(key, 6)
    s_logits = jax.random.normal(k1, (B, S), dtype=jnp.float32).astype(dtype)
    e_logits = jax.random.normal(k2, (B, S), dtype=jnp.float32).astype(dtype)
    a_logits = jax.random.normal(k3, (B, A), dtype=jnp.float32).astype(dtype)
    s_pos = jax.random.randint(k4, (B,), 0, S, dtype=jnp.int32)
    e_pos = jax.random.randint(k5, (B,), 0, S, dtype=jnp.int32)
    a_typ = jax.random.randint(k6, (B,), 0, A, dtype=jnp.int32)

    out = nq_loss(s_logits, e_logits, a_logits, s_pos, e_pos, a_typ, tile_b=tile_b)
    out = jax.block_until_ready(out)
    ref = _reference(s_logits, e_logits, a_logits, s_pos, e_pos, a_typ)
    assert jnp.allclose(out, ref, rtol=1e-5, atol=1e-4), (B, S, A, dtype, out, ref)


if __name__ == "__main__":
    key = jax.random.PRNGKey(0)
    ks = jax.random.split(key, 4)

    # Case 1: single tile covering the whole (sublane-aligned) batch.
    _run_case(ks[0], B=8, S=16, A=5)
    # Case 2: non-divisible batch -> 2 tiles, partial last tile masked in-kernel.
    _run_case(ks[1], B=13, S=40, A=5)
    # Case 3: batch smaller than a sublane tile -> one full-array block.
    _run_case(ks[2], B=5, S=24, A=5)
    # Case 4: bf16 logits (half the HBM bytes), 16-row sublane packing, 2 tiles.
    _run_case(ks[3], B=37, S=128, A=5, dtype=jnp.bfloat16)

    print("KERNEL_OK")
</pallas_src>

<mosaic_0001>
module attributes {stable_mosaic.version = 11 : i64} {
  func.func @_nq_loss_kernel(%arg0: i32, %arg1: memref<8x16xf32, #tpu.memory_space<vmem>>, %arg2: memref<8x16xf32, #tpu.memory_space<vmem>>, %arg3: memref<8x5xf32, #tpu.memory_space<vmem>>, %arg4: memref<8x3xi32, #tpu.memory_space<vmem>>, %arg5: memref<1x8x128xf32, #tpu.memory_space<vmem>>) attributes {dimension_semantics = [#tpu.dimension_semantics<parallel>], iteration_bounds = array<i64: 1>, scalar_prefetch = 0 : i64, scratch_operands = 0 : i64, tpu.core_type = #tpu.core_type<tc>, window_params = [{transform_indices = @transform_0, window_bounds = array<i64: 8, 16>}, {transform_indices = @transform_1, window_bounds = array<i64: 8, 16>}, {transform_indices = @transform_2, window_bounds = array<i64: 8, 5>}, {transform_indices = @transform_3, window_bounds = array<i64: 8, 3>}, {transform_indices = @transform_4, window_bounds = array<i64: 1, 8, 128>}]} {
    %c8_i32 = arith.constant 8 : i32
    %0 = arith.muli %arg0, %c8_i32 : i32
    %1 = tpu.iota {dimensions = array<i32: 0>} : vector<8x1xi32>
    %2 = vector.broadcast %0 : i32 to vector<8x1xi32>
    %3 = arith.addi %2, %1 : vector<8x1xi32>
    %c8_i32_0 = arith.constant 8 : i32
    %4 = vector.broadcast %c8_i32_0 : i32 to vector<8x1xi32>
    %5 = arith.cmpi slt, %3, %4 : vector<8x1xi32>
    %c0 = arith.constant 0 : index
    %c0_1 = arith.constant 0 : index
    %6 = vector.load %arg4[%c0, %c0_1] : memref<8x3xi32, #tpu.memory_space<vmem>>, vector<8x3xi32>
    %7 = tpu.iota {dimensions = array<i32: 1>} : vector<8x16xi32>
    %8 = tpu.iota {dimensions = array<i32: 1>} : vector<8x5xi32>
    %c0_2 = arith.constant 0 : index
    %c0_3 = arith.constant 0 : index
    %9 = vector.load %arg1[%c0_2, %c0_3] : memref<8x16xf32, #tpu.memory_space<vmem>>, vector<8x16xf32>
    %10 = vector.extract_strided_slice %6 {offsets = [0, 0], sizes = [8, 1], strides = [1, 1]} : vector<8x3xi32> to vector<8x1xi32>
    %cst = arith.constant dense<0xFF800000> : vector<8xf32>
    %11 = vector.multi_reduction <maximumf>, %9, %cst [1] : vector<8x16xf32> to vector<8xf32>
    %12 = vector.shape_cast %11 : vector<8xf32> to vector<8x1xf32>
    %13 = vector.broadcast %12 : vector<8x1xf32> to vector<8x16xf32>
    %14 = arith.subf %9, %13 : vector<8x16xf32>
    %15 = math.exp %14 : vector<8x16xf32>
    %cst_4 = arith.constant dense<0.000000e+00> : vector<8xf32>
    %16 = vector.multi_reduction <add>, %15, %cst_4 [1] : vector<8x16xf32> to vector<8xf32>
    %17 = vector.shape_cast %16 : vector<8xf32> to vector<8x1xf32>
    %18 = math.log %17 : vector<8x1xf32>
    %19 = vector.broadcast %10 : vector<8x1xi32> to vector<8x16xi32>
    %20 = arith.cmpi eq, %7, %19 : vector<8x16xi32>
    %cst_5 = arith.constant 0.000000e+00 : f32
    %21 = vector.broadcast %cst_5 : f32 to vector<8x16xf32>
    %22 = arith.select %20, %14, %21 : vector<8x16xi1>, vector<8x16xf32>
    %cst_6 = arith.constant dense<0.000000e+00> : vector<8xf32>
    %23 = vector.multi_reduction <add>, %22, %cst_6 [1] : vector<8x16xf32> to vector<8xf32>
    %24 = vector.shape_cast %23 : vector<8xf32> to vector<8x1xf32>
    %25 = arith.subf %18, %24 : vector<8x1xf32>
    %cst_7 = arith.constant 0.000000e+00 : f32
    %26 = vector.broadcast %cst_7 : f32 to vector<8x1xf32>
    %27 = arith.select %5, %25, %26 : vector<8x1xi1>, vector<8x1xf32>
    %28 = vector.shape_cast %27 : vector<8x1xf32> to vector<1x8x1xf32>
    %cst_8 = arith.constant dense<0.000000e+00> : vector<1xf32>
    %29 = vector.multi_reduction <add>, %28, %cst_8 [1, 2] : vector<1x8x1xf32> to vector<1xf32>
    %30 = vector.shape_cast %29 : vector<1xf32> to vector<1x1x1xf32>
    %31 = vector.extract %30[0, 0, 0] : f32 from vector<1x1x1xf32>
    %c0_9 = arith.constant 0 : index
    %c0_10 = arith.constant 0 : index
    %32 = vector.load %arg2[%c0_9, %c0_10] : memref<8x16xf32, #tpu.memory_space<vmem>>, vector<8x16xf32>
    %33 = vector.extract_strided_slice %6 {offsets = [0, 1], sizes = [8, 1], strides = [1, 1]} : vector<8x3xi32> to vector<8x1xi32>
    %cst_11 = arith.constant dense<0xFF800000> : vector<8xf32>
    %34 = vector.multi_reduction <maximumf>, %32, %cst_11 [1] : vector<8x16xf32> to vector<8xf32>
    %35 = vector.shape_cast %34 : vector<8xf32> to vector<8x1xf32>
    %36 = vector.broadcast %35 : vector<8x1xf32> to vector<8x16xf32>
    %37 = arith.subf %32, %36 : vector<8x16xf32>
    %38 = math.exp %37 : vector<8x16xf32>
    %cst_12 = arith.constant dense<0.000000e+00> : vector<8xf32>
    %39 = vector.multi_reduction <add>, %38, %cst_12 [1] : vector<8x16xf32> to vector<8xf32>
    %40 = vector.shape_cast %39 : vector<8xf32> to vector<8x1xf32>
    %41 = math.log %40 : vector<8x1xf32>
    %42 = vector.broadcast %33 : vector<8x1xi32> to vector<8x16xi32>
    %43 = arith.cmpi eq, %7, %42 : vector<8x16xi32>
    %cst_13 = arith.constant 0.000000e+00 : f32
    %44 = vector.broadcast %cst_13 : f32 to vector<8x16xf32>
    %45 = arith.select %43, %37, %44 : vector<8x16xi1>, vector<8x16xf32>
    %cst_14 = arith.constant dense<0.000000e+00> : vector<8xf32>
    %46 = vector.multi_reduction <add>, %45, %cst_14 [1] : vector<8x16xf32> to vector<8xf32>
    %47 = vector.shape_cast %46 : vector<8xf32> to vector<8x1xf32>
    %48 = arith.subf %41, %47 : vector<8x1xf32>
    %cst_15 = arith.constant 0.000000e+00 : f32
    %49 = vector.broadcast %cst_15 : f32 to vector<8x1xf32>
    %50 = arith.select %5, %48, %49 : vector<8x1xi1>, vector<8x1xf32>
    %51 = vector.shape_cast %50 : vector<8x1xf32> to vector<1x8x1xf32>
    %cst_16 = arith.constant dense<0.000000e+00> : vector<1xf32>
    %52 = vector.multi_reduction <add>, %51, %cst_16 [1, 2] : vector<1x8x1xf32> to vector<1xf32>
    %53 = vector.shape_cast %52 : vector<1xf32> to vector<1x1x1xf32>
    %54 = vector.extract %53[0, 0, 0] : f32 from vector<1x1x1xf32>
    %55 = arith.addf %31, %54 : f32
    %c0_17 = arith.constant 0 : index
    %c0_18 = arith.constant 0 : index
    %56 = vector.load %arg3[%c0_17, %c0_18] : memref<8x5xf32, #tpu.memory_space<vmem>>, vector<8x5xf32>
    %57 = vector.extract_strided_slice %6 {offsets = [0, 2], sizes = [8, 1], strides = [1, 1]} : vector<8x3xi32> to vector<8x1xi32>
    %cst_19 = arith.constant dense<0xFF800000> : vector<8xf32>
    %58 = vector.multi_reduction <maximumf>, %56, %cst_19 [1] : vector<8x5xf32> to vector<8xf32>
    %59 = vector.shape_cast %58 : vector<8xf32> to vector<8x1xf32>
    %60 = vector.broadcast %59 : vector<8x1xf32> to vector<8x5xf32>
    %61 = arith.subf %56, %60 : vector<8x5xf32>
    %62 = math.exp %61 : vector<8x5xf32>
    %cst_20 = arith.constant dense<0.000000e+00> : vector<8xf32>
    %63 = vector.multi_reduction <add>, %62, %cst_20 [1] : vector<8x5xf32> to vector<8xf32>
    %64 = vector.shape_cast %63 : vector<8xf32> to vector<8x1xf32>
    %65 = math.log %64 : vector<8x1xf32>
    %66 = vector.broadcast %57 : vector<8x1xi32> to vector<8x5xi32>
    %67 = arith.cmpi eq, %8, %66 : vector<8x5xi32>
    %cst_21 = arith.constant 0.000000e+00 : f32
    %68 = vector.broadcast %cst_21 : f32 to vector<8x5xf32>
    %69 = arith.select %67, %61, %68 : vector<8x5xi1>, vector<8x5xf32>
    %cst_22 = arith.constant dense<0.000000e+00> : vector<8xf32>
    %70 = vector.multi_reduction <add>, %69, %cst_22 [1] : vector<8x5xf32> to vector<8xf32>
    %71 = vector.shape_cast %70 : vector<8xf32> to vector<8x1xf32>
    %72 = arith.subf %65, %71 : vector<8x1xf32>
    %cst_23 = arith.constant 0.000000e+00 : f32
    %73 = vector.broadcast %cst_23 : f32 to vector<8x1xf32>
    %74 = arith.select %5, %72, %73 : vector<8x1xi1>, vector<8x1xf32>
    %75 = vector.shape_cast %74 : vector<8x1xf32> to vector<1x8x1xf32>
    %cst_24 = arith.constant dense<0.000000e+00> : vector<1xf32>
    %76 = vector.multi_reduction <add>, %75, %cst_24 [1, 2] : vector<1x8x1xf32> to vector<1xf32>
    %77 = vector.shape_cast %76 : vector<1xf32> to vector<1x1x1xf32>
    %78 = vector.extract %77[0, 0, 0] : f32 from vector<1x1x1xf32>
    %79 = arith.addf %55, %78 : f32
    %80 = vector.broadcast %79 : f32 to vector<1x8x128xf32>
    %c0_25 = arith.constant 0 : index
    %c0_26 = arith.constant 0 : index
    %c0_27 = arith.constant 0 : index
    %81 = vector.load %arg5[%c0_25, %c0_26, %c0_27] : memref<1x8x128xf32, #tpu.memory_space<vmem>>, vector<1x8x128xf32>
    tpu.vector_store %arg5[%c0_25, %c0_26, %c0_27], %80 {strides = array<i32>} : memref<1x8x128xf32, #tpu.memory_space<vmem>>, vector<1x8x128xf32>,
    return
  }
  func.func @transform_0(%arg0: i32) -> (i32, i32) {
    %c0_i32 = arith.constant 0 : i32
    %c0_i32_0 = arith.constant 0 : i32
    return %arg0, %c0_i32 : i32, i32
  }
  func.func @transform_1(%arg0: i32) -> (i32, i32) {
    %c0_i32 = arith.constant 0 : i32
    %c0_i32_0 = arith.constant 0 : i32
    return %arg0, %c0_i32 : i32, i32
  }
  func.func @transform_2(%arg0: i32) -> (i32, i32) {
    %c0_i32 = arith.constant 0 : i32
    %c0_i32_0 = arith.constant 0 : i32
    return %arg0, %c0_i32 : i32, i32
  }
  func.func @transform_3(%arg0: i32) -> (i32, i32) {
    %c0_i32 = arith.constant 0 : i32
    %c0_i32_0 = arith.constant 0 : i32
    return %arg0, %c0_i32 : i32, i32
  }
  func.func @transform_4(%arg0: i32) -> (i32, i32, i32) {
    %c0_i32 = arith.constant 0 : i32
    %c0_i32_0 = arith.constant 0 : i32
    %c0_i32_1 = arith.constant 0 : i32
    return %arg0, %c0_i32, %c0_i32_0 : i32, i32, i32
  }
}

</mosaic_0001>

<bundles_post_ra>
// kernel: tpu_custom_call.1
= control target key start
LH: loop header
LB: loop body
LE: loop exit
PB: predicated region body
PF: predicated region fallthrough
CT: control target
= control target key end

     0   :  { %9 = vsyncpa [#allocation3], 0  ;;  %s337_s0 = inlined_call_operand.vmem [shape: f32[8,16], index: 0, kind: input, shape index: {}]   ;;  %s338_s1 = inlined_call_operand.hbm [shape: f32[8,16], index: 1, kind: input, shape index: {}]   ;;  %s339_s2 = inlined_call_operand.hbm [shape: f32[8,5], index: 2, kind: input, shape index: {}]   ;;  %s340_s3 = inlined_call_operand.vmem [shape: s32[8,3], index: 3, kind: input, shape index: {}]   ;;  %s341_s4 = inlined_call_operand.hbm [shape: f32[1,8,128], index: 4, kind: output, shape index: {}]  }
   0x1   :  { %10 = vsyncpa [#allocation6], 0 }
   0x2   :  { %11 = vsyncpa [#allocation4], 0  ;;  %s19_s17 = sshll.u32 %s338_s1, 4  ;;  %s282_s18 = smov [#allocation2]   ;;  %s20_s17 = int_to_ptr.hbm [resolvable:$true] %s19_s17 }
   0x3   :  { %s21_s19 = sshll.u32 %s282_s18, 4  ;;  %s30_s22 = sshll.u32 %s339_s2, 4  ;;  %s22_s19 = int_to_ptr.vmem [resolvable:$true] %s21_s19  ;;  %s31_s22 = int_to_ptr.hbm [resolvable:$true] %s30_s22 }
   0x4   :  { %24 = dma.hbm_to_vmem [thread:$0]  %s20_s17, 128, %s22_s19, [#allocation3]  }
   0x5   :  { %s283_s23 = smov [#allocation5]  }
   0x6   :  { %s32_s24 = sshll.u32 %s283_s23, 4  ;;  %s33_s24 = int_to_ptr.vmem [resolvable:$true] %s32_s24 }
   0x7   :  { %35 = dma.hbm_to_vmem [thread:$0]  %s31_s22, 128, %s33_s24, [#allocation6]  }
   0x8   :  { %276 = dma.done.wait [#allocation3], 128  }
   0x9   :  { %277 = vsyncadd [#allocation3], 4294967168 }
   0xa   :  { %278 = dma.done.wait [#allocation6], 128  }
   0xb   :  { %279 = vsyncadd [#allocation6], 4294967168  ;;  %v284_v0 = vmov 1   ;;  %v285_v1 = vmov 0   ;;  %v286_v2 = vmov 2   ;;  %vm123_vm0 = vcmask 39936  }
   0xc   :  { %189 = vset.pattern.permute.xlu2 %v284_v0  ;;  %188 = vset.pattern.permute.xlu1 %v285_v1  ;;  %vm56_vm1 = vcmask 130048   ;;  %v122_v3 = vld [vmem:[#allocation5] sm:$0xff]  ;;  %v55_v4 = vld [vmem:[%s337_s0] sm:$0xff]  ;;  %v53_v13 = vlaneseq  ;;  %vm78_vm5 = vcmask 7168   ;;  %s287_s27 = smov [#allocation7]   ;;  %s165_s6 = sshll.u32 %s341_s4, 4  ;;  %s166_s6 = int_to_ptr.hbm [resolvable:$true] %s165_s6 }
   0xd   :  { %191 = vset.pattern.permute.xlu0 %v286_v2  ;;  %v124_v5 = vsel %vm123_vm0, %v122_v3, -inf  ;;  %v57_v6 = vsel %vm56_vm1, %v55_v4, -inf  ;;  %v52_v7 = vld [vmem:[%s340_s3] sm:$0xff]  ;;  %s163_s28 = sshll.u32 %s287_s27, 4  ;;  %s164_s28 = int_to_ptr.vmem [resolvable:$true] %s163_s28 }
   0xe   :  { %125 = vmax.xlane.f32.xlu1 %v124_v5  ;;  %58 = vmax.xlane.f32.xlu0 %v57_v6  ;;  %v89_v8 = vld [vmem:[#allocation2] sm:$0xff]  ;;  %v54_v16 = vand.u32 127, %v53_v13 }
   0xf   :  { %102 = vperm.xlu2 %189, %v52_v7   ;;  %v90_v9 = vsel %vm56_vm1, %v89_v8, -inf }
  0x16   :  { %91 = vmax.xlane.f32.xlu0 %v90_v9 }
  0x17   :  { %190 = vset.pattern.permute.xlu2 %v286_v2 }
  0x18   :  { %136 = vperm.xlu2 %190, %v52_v7  }
  0x27   :  { %69 = vperm.xlu1 %188, %v52_v7  }
  0x69   :  { %v103_v17 = vpop.permute.xlu2 %102 }
  0x6a   :  { %vm104_vm2 = vcmp.eq.s32.totalorder %v54_v16, %v103_v17 }
  0x72   :  { %v137_v32 = vpop.permute.xlu2 %136 }
  0x73   :  { %vm138_vm4 = vcmp.eq.s32.totalorder %v54_v16, %v137_v32 }
  0x81   :  { %v59_v10 = vpop.xlane.xlu0 %58  ;;  %v126_v11 = vpop.xlane.xlu1 %125 }
  0x82   :  { %v60_v12 = vsub.f32 %v55_v4, %v59_v10  ;;  %v127_v15 = vsub.f32 %v122_v3, %v126_v11 }
  0x84   :  { %v61_v14 = vmul.f32 1.442695, %v60_v12  ;;  %v128_v18 = vmul.f32 1.442695, %v127_v15  ;;  %v139_v34 = vsel %vm138_vm4, %v127_v15, 0.0 }
  0x85   :  { %v140_v35 = vsel %vm123_vm0, %v139_v34, 0.0 }
  0x86   :  { %192 = vpow2.f32 %v61_v14 }
  0x87   :  { %194 = vpow2.f32 %v128_v18 }
  0x89   :  { %v92_v19 = vpop.xlane.xlu0 %91 }
  0x8a   :  { %v93_v20 = vsub.f32 %v89_v8, %v92_v19 }
  0x8c   :  { %v193_v21 = vpop.eup %192  ;;  %v94_v22 = vmul.f32 1.442695, %v93_v20  ;;  %v105_v23 = vsel %vm104_vm2, %v93_v20, 0.0 }
  0x8d   :  { %v63_v24 = vsel %vm56_vm1, %v193_v21, 0.0  ;;  %v106_v25 = vsel %vm56_vm1, %v105_v23, 0.0  ;;  %v195_v26 = vpop.eup %194 }
  0x8e   :  { %196 = vpow2.f32 %v94_v22  ;;  %64 = vadd.xlane.f32.xlu0 %v63_v24  ;;  %107 = vadd.xlane.f32.xlu1 %v106_v25  ;;  %v130_v28 = vsel %vm123_vm0, %v195_v26, 0.0 }
  0x94   :  { %v197_v27 = vpop.eup %196 }
  0x95   :  { %v96_v29 = vsel %vm56_vm1, %v197_v27, 0.0 }
  0x96   :  { %131 = vadd.xlane.f32.xlu0 %v130_v28  ;;  %97 = vadd.xlane.f32.xlu2 %v96_v29 }
  0x99   :  { %v70_v30 = vpop.permute.xlu1 %69 }
  0x9a   :  { %vm71_vm3 = vcmp.eq.s32.totalorder %v54_v16, %v70_v30 }
  0x9b   :  { %v72_v31 = vsel %vm71_vm3, %v60_v12, 0.0 }
  0x9c   :  { %v73_v33 = vsel %vm56_vm1, %v72_v31, 0.0 }
  0x9e   :  { %74 = vadd.xlane.f32.xlu0 %v73_v33 }
  0xa6   :  { %141 = vadd.xlane.f32.xlu0 %v140_v35 }
 0x101   :  { %v65_v36 = vpop.xlane.xlu0 %64  ;;  %v108_v47 = vpop.xlane.xlu1 %107 }
 0x102   :  { %198 = vlog2.f32 %v65_v36 }
 0x108   :  { %v199_v39 = vpop.eup %198 }
 0x109   :  { %v132_v37 = vpop.xlane.xlu0 %131  ;;  %v98_v38 = vpop.xlane.xlu2 %97  ;;  %v67_v40 = vmul.f32 0.6931472, %v199_v39 }
 0x10a   :  { %200 = vlog2.f32 %v98_v38 }
 0x10b   :  { %202 = vlog2.f32 %v132_v37 }
 0x110   :  { %v201_v41 = vpop.eup %200 }
 0x111   :  { %v75_v42 = vpop.xlane.xlu0 %74  ;;  %v100_v44 = vmul.f32 0.6931472, %v201_v41  ;;  %v203_v46 = vpop.eup %202 }
 0x112   :  { %v76_v43 = vsub.f32 %v67_v40, %v75_v42  ;;  %v134_v48 = vmul.f32 0.6931472, %v203_v46 }
 0x113   :  { %v109_v49 = vsub.f32 %v100_v44, %v108_v47 }
 0x114   :  { %v79_v45 = vsel %vm78_vm5, %v76_v43, 0.0 }
 0x115   :  { %80 = vadd.xlane.f32.xlu0 %v79_v45  ;;  %v111_v53 = vsel %vm78_vm5, %v109_v49, 0.0 }
 0x119   :  { %v142_v50 = vpop.xlane.xlu0 %141 }
 0x11a   :  { %v143_v51 = vsub.f32 %v134_v48, %v142_v50 }
 0x11c   :  { %v145_v52 = vsel %vm78_vm5, %v143_v51, 0.0 }
 0x11d   :  { %146 = vadd.xlane.f32.xlu2 %v145_v52  ;;  %112 = vadd.xlane.f32.xlu0 %v111_v53 }
 0x188   :  { %v81_v54 = vpop.xlane.xlu0 %80 }
 0x189   :  { %v82_v55 = vrot.slane %v81_v54, 4 }
 0x18b   :  { %v83_v56 = vadd.f32 %v82_v55, %v81_v54 }
 0x18d   :  { %v84_v57 = vrot.slane %v83_v56, 2 }
 0x18f   :  { %v85_v58 = vadd.f32 %v84_v57, %v83_v56 }
 0x190   :  { %v147_v59 = vpop.xlane.xlu2 %146  ;;  %v113_v60 = vpop.xlane.xlu0 %112 }
 0x191   :  { %v148_v61 = vrot.slane %v147_v59, 4  ;;  %v114_v62 = vrot.slane %v113_v60, 4  ;;  %v86_v63 = vrot.slane %v85_v58, 1 }
 0x193   :  { %v149_v0 = vadd.f32 %v148_v61, %v147_v59  ;;  %v115_v1 = vadd.f32 %v114_v62, %v113_v60  ;;  %v87_v2 = vadd.f32 %v86_v63, %v85_v58 }
 0x195   :  { %v150_v3 = vrot.slane %v149_v0, 2  ;;  %v116_v4 = vrot.slane %v115_v1, 2  ;;  %176 = vpush %v87_v2 }
 0x197   :  { %v151_v5 = vadd.f32 %v150_v3, %v149_v0  ;;  %v117_v6 = vadd.f32 %v116_v4, %v115_v1 }
 0x199   :  { %v118_v7 = vrot.slane %v117_v6, 1  ;;  %v152_v8 = vrot.slane %v151_v5, 1 }
 0x19b   :  { %v119_v9 = vadd.f32 %v118_v7, %v117_v6  ;;  %v153_v10 = vadd.f32 %v152_v8, %v151_v5 }
 0x19d   :  { %178 = vpush %v119_v9 }
 0x19e   :  { %180 = vpush %v153_v10 }
 0x1c6   :  { %s177_s0 = spop %176 }
 0x1ce   :  { %s179_s3 = spop %178 }
 0x1cf   :  { %s121_s29 = sadd.f32 %s179_s3, %s177_s0  ;;  %s181_s7 = spop %180 }
 0x1d1   :  { %s155_s8 = sadd.f32 %s181_s7, %s121_s29 }
 0x1d3   :  { %v156_v11 = vstv %s155_s8 }
 0x1d4   :  { %157 = vst [vmem:[#allocation7] sm:$0xff] %v156_v11 }
 0x1d5   :  { %168 = dma.vmem_to_hbm [thread:$0]  %s164_s28, 128, %s166_s6, [#allocation4]  }
 0x1d6   :  { %280 = dma.done.wait [#allocation4], 128  }
 0x1d7   :  { %281 = vsyncadd [#allocation4], 4294967168 }
 0x1d8   :  { %173 = vsyncpa [#allocation3], 1 }
 0x1d9   :  { %174 = vsyncpa [#allocation6], 1 }
 0x1da   :  { %175 = vsyncpa [#allocation4], 1 }

</bundles_post_ra>
